<compile_context>
chip_gen: v5e
topology: v5e:2x2
jax: 0.10.0
libtpu: 0.0.40
codegen_flags: <defaults>
</compile_context>

<pallas_src>
import math

import jax
import jax.numpy as jnp
from jax.experimental import pallas as pl
from jax.experimental.pallas import tpu as pltpu


# ---------------------------------------------------------------------------
# Module hyper-parameters (match ExpNormalSmearing defaults)
# ---------------------------------------------------------------------------
CUTOFF_LOWER = 0.0
CUTOFF_UPPER = 5.0
NUM_RBF = 50
ALPHA = 5.0 / (CUTOFF_UPPER - CUTOFF_LOWER)
LANE = 128


def initial_params(num_rbf: int, cutoff_lower: float, cutoff_upper: float):
    """Deterministic parameter init, identical to ExpNormalSmearing._initial_params."""
    start_value = math.exp(-cutoff_upper + cutoff_lower)
    means = jnp.linspace(start_value, 1.0, num_rbf, dtype=jnp.float32)
    betas = jnp.full(
        (num_rbf,), (2.0 / num_rbf * (1.0 - start_value)) ** (-2), dtype=jnp.float32
    )
    return means, betas


# ---------------------------------------------------------------------------
# Kernel A: lane-tiled path (large H*W)
#   dist block : (1, 1, tile)   -> d  (1, T), lane-major
#   means/-betas: (R, 1)        -> resident, broadcast along lanes
#   out block  : (1, R, tile)   -> lane-dense stores in final layout
# ---------------------------------------------------------------------------
def _exp_normal_kernel_lane(dist_ref, means_ref, nbetas_ref, out_ref):
    d = dist_ref[0]                                   # (1, T) float32
    means = means_ref[...]                            # (R, 1)
    nbetas = nbetas_ref[...]                          # (R, 1)  (already -betas)

    # CosineCutoff(0, cutoff_upper):
    #   0.5 * (cos(d * pi / cutoff_upper) + 1) * (d < cutoff_upper)
    cut = 0.5 * (jnp.cos(d * (math.pi / CUTOFF_UPPER)) + 1.0)
    cut = jnp.where(d < CUTOFF_UPPER, cut, 0.0)       # (1, T)

    e = jnp.exp(ALPHA * (CUTOFF_LOWER - d))           # (1, T)
    diff = e - means                                  # (R, T) broadcast
    out_ref[0] = (cut * jnp.exp(nbetas * diff * diff)).astype(out_ref.dtype)


# ---------------------------------------------------------------------------
# Kernel B: batch-blocked path (small H*W, possibly large B)
#   dist block : (Bt, 1, HW)    -> d (Bt, HW)
#   out block  : (Bt, R, HW)
# ---------------------------------------------------------------------------
def _exp_normal_kernel_batch(dist_ref, means_ref, nbetas_ref, out_ref):
    d = jnp.squeeze(dist_ref[...], axis=1)            # (Bt, HW) float32
    means = means_ref[...][None]                       # (1, R, 1)
    nbetas = nbetas_ref[...][None]                     # (1, R, 1)

    cut = 0.5 * (jnp.cos(d * (math.pi / CUTOFF_UPPER)) + 1.0)
    cut = jnp.where(d < CUTOFF_UPPER, cut, 0.0)        # (Bt, HW)

    e = jnp.exp(ALPHA * (CUTOFF_LOWER - d))            # (Bt, HW)
    diff = e[:, None, :] - means                       # (Bt, R, HW)
    out_ref[...] = (cut[:, None, :] * jnp.exp(nbetas * diff * diff)).astype(
        out_ref.dtype
    )


def exp_normal_smearing(dist: jax.Array,
                        means: jax.Array,
                        betas: jax.Array,
                        *,
                        tile_hw: int = 8192,
                        out_dtype=jnp.float32) -> jax.Array:
    """dist: (B, 1, H, W) float32  ->  (B, num_rbf, H, W) out_dtype."""
    B, C, H, W = dist.shape
    assert C == 1, "PyTorch forward requires the dim-1 axis to be size 1 (squeeze(4))"
    R = means.shape[0]
    HW = H * W

    d_flat = dist.reshape(B, 1, HW).astype(jnp.float32)
    means2 = means.reshape(R, 1).astype(jnp.float32)
    # Pre-negate betas once in the wrapper (kernel computes exp(nbetas*diff^2)).
    nbetas2 = (-betas).reshape(R, 1).astype(jnp.float32)

    cost = pl.CostEstimate(
        flops=B * HW * (4 * R + 6),
        transcendentals=B * HW * (R + 2),
        bytes_accessed=4 * B * HW + B * HW * R * jnp.dtype(out_dtype).itemsize,
    )

    if HW >= tile_hw:
        # ------------------- lane-tiled path -------------------
        tile = tile_hw
        n_hw = pl.cdiv(HW, tile)
        HWp = n_hw * tile
        # Pad only the (cheap, 1/R-sized) distance input so every input block is
        # fully in-bounds. The output is NOT padded: Pallas masks the stores of
        # the final partial output block, so no post-kernel slice/copy of the
        # R-times-expanded result is ever materialized.
        d_in = d_flat if HWp == HW else jnp.pad(
            d_flat, ((0, 0), (0, 0), (0, HWp - HW)))

        out = pl.pallas_call(
            _exp_normal_kernel_lane,
            out_shape=jax.ShapeDtypeStruct((B, R, HW), out_dtype),
            grid_spec=pltpu.PrefetchScalarGridSpec(
                num_scalar_prefetch=0,
                grid=(B, n_hw),
                in_specs=[
                    pl.BlockSpec((1, 1, tile), lambda b, j: (b, 0, j)),  # distances
                    pl.BlockSpec((R, 1), lambda b, j: (0, 0)),           # means
                    pl.BlockSpec((R, 1), lambda b, j: (0, 0)),           # -betas
                ],
                out_specs=pl.BlockSpec((1, R, tile), lambda b, j: (b, 0, j)),
            ),
            compiler_params=pltpu.CompilerParams(
                dimension_semantics=("parallel", "parallel"),
            ),
            cost_estimate=cost,
        )(d_in, means2, nbetas2)
    else:
        # ------------------- batch-blocked path -------------------
        # Fold several batch rows into one grid step so per-step output stays
        # large (amortizes ~0.35us/step), while keeping >=2 grid steps when
        # B > 1 so both v7x TensorCores receive work.
        Bt = max(1, tile_hw // max(HW, 1))
        if B > 1:
            Bt = min(Bt, (B + 1) // 2)
        Bt = min(Bt, B)
        nb = pl.cdiv(B, Bt)

        out = pl.pallas_call(
            _exp_normal_kernel_batch,
            out_shape=jax.ShapeDtypeStruct((B, R, HW), out_dtype),
            grid_spec=pltpu.PrefetchScalarGridSpec(
                num_scalar_prefetch=0,
                grid=(nb,),
                in_specs=[
                    pl.BlockSpec((Bt, 1, HW), lambda b: (b, 0, 0)),   # distances
                    pl.BlockSpec((R, 1), lambda b: (0, 0)),           # means
                    pl.BlockSpec((R, 1), lambda b: (0, 0)),           # -betas
                ],
                out_specs=pl.BlockSpec((Bt, R, HW), lambda b: (b, 0, 0)),
            ),
            compiler_params=pltpu.CompilerParams(
                dimension_semantics=("parallel",),
            ),
            cost_estimate=cost,
        )(d_flat, means2, nbetas2)

    # (B, R, HW) -> (B, R, H, W): contiguous reshape, no transpose, no slice.
    return out.reshape(B, R, H, W)


# ---------------------------------------------------------------------------
# Pure-JAX reference (mirrors the PyTorch forward) for verification
# ---------------------------------------------------------------------------
def exp_normal_smearing_ref(dist, means, betas):
    d = dist[..., None]                                       # (B,1,H,W,1)
    cut = 0.5 * (jnp.cos(d * math.pi / CUTOFF_UPPER) + 1.0)
    cut = cut * (d < CUTOFF_UPPER).astype(d.dtype)
    r = cut * jnp.exp(-betas * (jnp.exp(ALPHA * (-d + CUTOFF_LOWER)) - means) ** 2)
    return jnp.squeeze(jnp.swapaxes(r, 1, 4), axis=4)         # (B,R,H,W)


if __name__ == "__main__":
    means, betas = initial_params(NUM_RBF, CUTOFF_LOWER, CUTOFF_UPPER)

    # --- small-HW (batch-blocked) path: B=2, H=W=16 ---
    key = jax.random.PRNGKey(0)
    B, H, W = 2, 16, 16
    # distances in [0, ~6) so some values exceed the cutoff (exercises the mask)
    dist = jax.random.uniform(key, (B, 1, H, W), dtype=jnp.float32,
                              minval=0.0, maxval=6.0)
    out = jax.block_until_ready(exp_normal_smearing(dist, means, betas))
    ref = exp_normal_smearing_ref(dist, means, betas)
    assert out.shape == (B, NUM_RBF, H, W)
    assert jnp.allclose(out, ref, atol=1e-5, rtol=1e-5)

    # --- lane-tiled path with a non-tile-multiple boundary (masked final block) ---
    H2, W2 = 30, 32   # HW=960, tile_hw=512 -> grid=(1,2), last block partial
    dist2 = jax.random.uniform(jax.random.PRNGKey(1), (1, 1, H2, W2),
                               dtype=jnp.float32, minval=0.0, maxval=6.0)
    out2 = jax.block_until_ready(
        exp_normal_smearing(dist2, means, betas, tile_hw=512))
    ref2 = exp_normal_smearing_ref(dist2, means, betas)
    assert out2.shape == (1, NUM_RBF, H2, W2)
    assert jnp.allclose(out2, ref2, atol=1e-5, rtol=1e-5)

    print("KERNEL_OK")
</pallas_src>

<mosaic_0001>
module attributes {stable_mosaic.version = 11 : i64} {
  func.func @_exp_normal_kernel_batch(%arg0: i32, %arg1: memref<1x1x256xf32, #tpu.memory_space<vmem>>, %arg2: memref<50x1xf32, #tpu.memory_space<vmem>>, %arg3: memref<50x1xf32, #tpu.memory_space<vmem>>, %arg4: memref<1x50x256xf32, #tpu.memory_space<vmem>>) attributes {dimension_semantics = [#tpu.dimension_semantics<parallel>], iteration_bounds = array<i64: 2>, scalar_prefetch = 0 : i64, scratch_operands = 0 : i64, tpu.core_type = #tpu.core_type<tc>, window_params = [{transform_indices = @transform_0, window_bounds = array<i64: 1, 1, 256>}, {pipeline_mode = #tpu.pipeline_mode<synchronous>, transform_indices = @transform_1, window_bounds = array<i64: 50, 1>}, {pipeline_mode = #tpu.pipeline_mode<synchronous>, transform_indices = @transform_2, window_bounds = array<i64: 50, 1>}, {transform_indices = @transform_3, window_bounds = array<i64: 1, 50, 256>}]} {
    %c0 = arith.constant 0 : index
    %c0_0 = arith.constant 0 : index
    %c0_1 = arith.constant 0 : index
    %0 = vector.load %arg1[%c0, %c0_0, %c0_1] : memref<1x1x256xf32, #tpu.memory_space<vmem>>, vector<1x1x256xf32>
    %1 = vector.shape_cast %0 : vector<1x1x256xf32> to vector<1x256xf32>
    %c0_2 = arith.constant 0 : index
    %c0_3 = arith.constant 0 : index
    %2 = vector.load %arg2[%c0_2, %c0_3] : memref<50x1xf32, #tpu.memory_space<vmem>>, vector<50x1xf32>
    %3 = vector.shape_cast %2 : vector<50x1xf32> to vector<1x50x1xf32>
    %c0_4 = arith.constant 0 : index
    %c0_5 = arith.constant 0 : index
    %4 = vector.load %arg3[%c0_4, %c0_5] : memref<50x1xf32, #tpu.memory_space<vmem>>, vector<50x1xf32>
    %5 = vector.shape_cast %4 : vector<50x1xf32> to vector<1x50x1xf32>
    %cst = arith.constant 0.628318548 : f32
    %6 = vector.broadcast %cst : f32 to vector<1x256xf32>
    %7 = arith.mulf %1, %6 : vector<1x256xf32>
    %8 = math.cos %7 : vector<1x256xf32>
    %cst_6 = arith.constant 1.000000e+00 : f32
    %9 = vector.broadcast %cst_6 : f32 to vector<1x256xf32>
    %10 = arith.addf %8, %9 : vector<1x256xf32>
    %cst_7 = arith.constant 5.000000e-01 : f32
    %11 = vector.broadcast %cst_7 : f32 to vector<1x256xf32>
    %12 = arith.mulf %11, %10 : vector<1x256xf32>
    %cst_8 = arith.constant 5.000000e+00 : f32
    %13 = vector.broadcast %cst_8 : f32 to vector<1x256xf32>
    %14 = arith.cmpf olt, %1, %13 : vector<1x256xf32>
    %cst_9 = arith.constant 0.000000e+00 : f32
    %15 = vector.broadcast %cst_9 : f32 to vector<1x256xf32>
    %16 = arith.select %14, %12, %15 : vector<1x256xi1>, vector<1x256xf32>
    %cst_10 = arith.constant 0.000000e+00 : f32
    %17 = vector.broadcast %cst_10 : f32 to vector<1x256xf32>
    %18 = arith.subf %17, %1 : vector<1x256xf32>
    %cst_11 = arith.constant 1.000000e+00 : f32
    %19 = vector.broadcast %cst_11 : f32 to vector<1x256xf32>
    %20 = arith.mulf %19, %18 : vector<1x256xf32>
    %21 = math.exp %20 : vector<1x256xf32>
    %22 = vector.shape_cast %21 : vector<1x256xf32> to vector<1x1x256xf32>
    %23 = vector.broadcast %22 : vector<1x1x256xf32> to vector<1x50x256xf32>
    %24 = vector.broadcast %3 : vector<1x50x1xf32> to vector<1x50x256xf32>
    %25 = arith.subf %23, %24 : vector<1x50x256xf32>
    %26 = vector.shape_cast %16 : vector<1x256xf32> to vector<1x1x256xf32>
    %27 = vector.broadcast %5 : vector<1x50x1xf32> to vector<1x50x256xf32>
    %28 = arith.mulf %27, %25 : vector<1x50x256xf32>
    %29 = arith.mulf %28, %25 : vector<1x50x256xf32>
    %30 = math.exp %29 : vector<1x50x256xf32>
    %31 = vector.broadcast %26 : vector<1x1x256xf32> to vector<1x50x256xf32>
    %32 = arith.mulf %31, %30 : vector<1x50x256xf32>
    %c0_12 = arith.constant 0 : index
    %c0_13 = arith.constant 0 : index
    %c0_14 = arith.constant 0 : index
    %33 = vector.load %arg4[%c0_12, %c0_13, %c0_14] : memref<1x50x256xf32, #tpu.memory_space<vmem>>, vector<1x50x256xf32>
    tpu.vector_store %arg4[%c0_12, %c0_13, %c0_14], %32 {strides = array<i32>} : memref<1x50x256xf32, #tpu.memory_space<vmem>>, vector<1x50x256xf32>,
    return
  }
  func.func @transform_0(%arg0: i32) -> (i32, i32, i32) {
    %c0_i32 = arith.constant 0 : i32
    %c0_i32_0 = arith.constant 0 : i32
    %c0_i32_1 = arith.constant 0 : i32
    return %arg0, %c0_i32, %c0_i32_0 : i32, i32, i32
  }
  func.func @transform_1(%arg0: i32) -> (i32, i32) {
    %c0_i32 = arith.constant 0 : i32
    %c0_i32_0 = arith.constant 0 : i32
    %c0_i32_1 = arith.constant 0 : i32
    return %c0_i32, %c0_i32_0 : i32, i32
  }
  func.func @transform_2(%arg0: i32) -> (i32, i32) {
    %c0_i32 = arith.constant 0 : i32
    %c0_i32_0 = arith.constant 0 : i32
    %c0_i32_1 = arith.constant 0 : i32
    return %c0_i32, %c0_i32_0 : i32, i32
  }
  func.func @transform_3(%arg0: i32) -> (i32, i32, i32) {
    %c0_i32 = arith.constant 0 : i32
    %c0_i32_0 = arith.constant 0 : i32
    %c0_i32_1 = arith.constant 0 : i32
    return %arg0, %c0_i32, %c0_i32_0 : i32, i32, i32
  }
}

</mosaic_0001>

<bundles_post_ra>
// kernel: tpu_custom_call.1
= control target key start
LH: loop header
LB: loop body
LE: loop exit
PB: predicated region body
PF: predicated region fallthrough
CT: control target
= control target key end

     0   :  { %s674_s12 = smov 0   ;;  %s863_s0 = inlined_call_operand.vmem [shape: f32[2,1,256], index: 0, kind: input, shape index: {}]   ;;  %s864_s1 = inlined_call_operand.vmem [shape: f32[50,1], index: 1, kind: input, shape index: {}]   ;;  %s865_s2 = inlined_call_operand.vmem [shape: f32[50,1], index: 2, kind: input, shape index: {}]   ;;  %s866_s3 = inlined_call_operand.vmem [shape: f32[2,50,256], index: 3, kind: output, shape index: {}]  }
   0x1 LB: > { %s578_s13 = sadd.s32 4294967295, %s645_s12   ;;  %p582_p0 = scmp.ge.s32.totalorder %s645_s12, 1  ;;  %s645_s12 = sphi %s674_s12, %s13_s12  }
   0x2   : > { %p136_p1 = scmp.lt.s32.totalorder %s645_s12, 3 }
   0x4   : > { %p137_p2 = pnand %p582_p0, %p136_p1 }
   0x5   : > { %p159_p3 = scmp.lt.s32.totalorder (!%p137_p2), %s578_s13, 1 }
   0x6   : > { %140 = sbr.rel (%p137_p2) target bundleno = 179 (0xb3), region = 32 }
   0xb   : > { %v647_v0 = vmov 0   ;;  %s870_s13 = smov (!%p159_p3, %s578_s13), 1  ;;  %v171_v1 = vld [vmem:[%s864_s1 + $0x10] sm:$0xff]  ;;  %v169_v2 = vld [vmem:[%s864_s1] sm:$0xff]  ;;  %v172_v6 = vld [vmem:[%s864_s1 + $0x18] sm:$0xff] }
   0xc   : > { %607 = vset.pattern.permute.xlu1 %v647_v0  ;;  %606 = vset.pattern.permute.xlu0 %v647_v0  ;;  %v173_v3 = vld [vmem:[%s864_s1 + $0x20] sm:$0xff]  ;;  %s583_s20 = sshll.u32 %s870_s13, 1  ;;  %v170_v7 = vld [vmem:[%s864_s1 + $0x8] sm:$0xff]  ;;  %v175_v16 = vld [vmem:[%s864_s1 + $0x30] sm:$0x3]  ;;  %s590_s21 = smul.u32 112, %s870_s13 }
   0xd   : > { %608 = vset.pattern.permute.xlu2 %v647_v0  ;;  %362 = vperm.xlu1 %607, %v171_v1   ;;  %s162_s23 = scalar_lea.vmem %s863_s0, %s583_s20  ;;  %v174_v9 = vld [vmem:[%s864_s1 + $0x28] sm:$0xff]  ;;  %v176_v15 = vld [vmem:[%s865_s2] sm:$0xff]  ;;  %v648_v23 = vmov 683565275   ;;  %v649_v25 = vmov 2475754826  }
   0xe   : > { %352 = vperm.xlu0 %606, %v169_v2   ;;  %372 = vperm.xlu2 %608, %v173_v3   ;;  %v700_v4 = vld [vmem:[%s162_s23] sm:$0x3]  ;;  %v177_v17 = vld [vmem:[%s865_s2 + $0x8] sm:$0xff]  ;;  %v650_v27 = vmov 2131351028   ;;  %v179_v40 = vld [vmem:[%s865_s2 + $0x18] sm:$0xff]  ;;  %s818_s24 = scalar_lea.vmem %s866_s3, %s590_s21 }
   0xf   : > { %v703_v5 = vmul.f32 0.62831855, %v700_v4  ;;  %v651_v29 = vmov 2102212464   ;;  %v652_v31 = vmov 920167782  }
  0x10   : > { %v653_v37 = vmov 1326507024   ;;  %v178_v41 = vld [vmem:[%s865_s2 + $0x10] sm:$0xff]  ;;  %v180_v45 = vld [vmem:[%s865_s2 + $0x20] sm:$0xff]  ;;  %v181_v63 = vld [vmem:[%s865_s2 + $0x28] sm:$0xff] }
  0x11   : > { %v187_v8 = vand.u32 2139095040, %v703_v5  ;;  %v184_v11 = vand.u32 2147483647, %v703_v5  ;;  %v182_v62 = vld [vmem:[%s865_s2 + $0x30] sm:$0x3]  ;;  %vm186_vm12 = vcmp.lt.s32.totalorder %v703_v5, 0 }
  0x13   : > { %v188_v10 = vshrl.u32 %v187_v8, 23  ;;  %v191_v14 = vand.u32 8388607, %v184_v11  ;;  %vm784_vm13 = vcmp.le.f32.partialorder %v184_v11, 0.7853982 }
  0x15   : > { %367 = vperm.xlu1 %607, %v172_v6   ;;  %v585_v12 = vadd.s32 4294967169, %v188_v10  ;;  %v192_v20 = vor.u32 8388608, %v191_v14 }
  0x16   : > { %357 = vperm.xlu0 %606, %v170_v7   ;;  %377 = vperm.xlu2 %608, %v174_v9  }
  0x17   : > { %v194_v13 = vadd.s32 1, %v585_v12  ;;  %v730_v39 = vshll.u32 %v192_v20, 8 }
  0x19   : > { %vm195_vm0 = vcmp.gt.s32.totalorder %v194_v13, 0  ;;  %v233_v54 = vand.u32 65535, %v730_v39  ;;  %v234_v55 = vshrl.u32 %v730_v39, 16 }
  0x1a   : > { %v196_v18 = vsel %vm195_vm0, %v194_v13, 0 }
  0x1b   : > { %v198_v19 = vand.u32 31, %v196_v18  ;;  %v727_v21 = vshrl.u32 %v196_v18, 5 }
  0x1d   : > { %401 = vperm.xlu1 %607, %v176_v15   ;;  %v199_v22 = vsub.s32 32, %v198_v19  ;;  %v201_v24 = vshll.u32 %v648_v23, %v198_v19  ;;  %v204_v26 = vshll.u32 %v649_v25, %v198_v19  ;;  %v207_v28 = vshll.u32 %v650_v27, %v198_v19 }
  0x1e   : > { %382 = vperm.xlu0 %606, %v175_v16   ;;  %406 = vperm.xlu2 %608, %v177_v17   ;;  %v210_v30 = vshll.u32 %v651_v29, %v198_v19  ;;  %v213_v32 = vshll.u32 %v652_v31, %v198_v19  ;;  %vm216_vm1 = vcmp.lt.s32.totalorder %v727_v21, 1  ;;  %vm219_vm2 = vcmp.lt.s32.totalorder %v727_v21, 4 }
  0x1f   : > { %v202_v33 = vshrl.u32 %v649_v25, %v199_v22  ;;  %v205_v34 = vshrl.u32 %v650_v27, %v199_v22  ;;  %v208_v35 = vshrl.u32 %v651_v29, %v199_v22  ;;  %v211_v36 = vshrl.u32 %v652_v31, %v199_v22 }
  0x20   : > { %v214_v38 = vshrl.u32 %v653_v37, %v199_v22  ;;  %vm218_vm3 = vcmp.lt.s32.totalorder %v727_v21, 3  ;;  %vm217_vm4 = vcmp.lt.s32.totalorder %v727_v21, 2  ;;  %v200_v1 = vshrl.u32 %v648_v23, %v199_v22 }
  0x21   : > { %v203_v42 = vor.u32 %v202_v33, %v201_v24  ;;  %v206_v43 = vor.u32 %v205_v34, %v204_v26  ;;  %v209_v44 = vor.u32 %v208_v35, %v207_v28  ;;  %v212_v46 = vor.u32 %v211_v36, %v210_v30 }
  0x22   : > { %v215_v47 = vor.u32 %v214_v38, %v213_v32 }
  0x23   : > { %v224_v48 = vsel %vm216_vm1, %v203_v42, %v206_v43  ;;  %v228_v49 = vsel %vm216_vm1, %v206_v43, %v209_v44  ;;  %v225_v50 = vsel %vm219_vm2, %v212_v46, 920167782  ;;  %v220_v17 = vsel %vm216_vm1, %v200_v1, %v203_v42 }
  0x24   : > { %v229_v51 = vsel %vm219_vm2, %v215_v47, 1326507024  ;;  %v226_v52 = vsel %vm218_vm3, %v209_v44, %v225_v50  ;;  %v221_v19 = vsel %vm219_vm2, %v209_v44, 2102212464  ;;  %vm327_vm1 = vweird.f32 %v703_v5 }
  0x25   : > { %416 = vperm.xlu1 %607, %v179_v40   ;;  %v230_v53 = vsel %vm218_vm3, %v212_v46, %v229_v51  ;;  %v227_v56 = vsel %vm217_vm4, %v224_v48, %v226_v52  ;;  %v222_v29 = vsel %vm218_vm3, %v206_v43, %v221_v19  ;;  %vm340_vm2 = vcmp.lt.f32.partialorder %v700_v4, 5.0 }
  0x26   : > { %411 = vperm.xlu0 %606, %v178_v41   ;;  %421 = vperm.xlu2 %608, %v180_v45   ;;  %v231_v57 = vsel %vm217_vm4, %v228_v49, %v230_v53  ;;  %v257_v60 = vand.u32 65535, %v227_v56  ;;  %v258_v61 = vshrl.u32 %v227_v56, 16  ;;  %v223_v37 = vsel %vm217_vm4, %v220_v17, %v222_v29 }
  0x27   : > { %v235_v58 = vand.u32 65535, %v231_v57  ;;  %v236_v59 = vshrl.u32 %v231_v57, 16  ;;  %v277_v42 = vmul.u32 %v730_v39, %v223_v37 }
  0x28   : > { %v259_v7 = vmul.u32 %v257_v60, %v233_v54  ;;  %v260_v8 = vmul.u32 %v258_v61, %v233_v54  ;;  %v261_v9 = vmul.u32 %v257_v60, %v234_v55  ;;  %v262_v14 = vmul.u32 %v258_v61, %v234_v55 }
  0x29   : > { %v237_v2 = vmul.u32 %v235_v58, %v233_v54  ;;  %v238_v3 = vmul.u32 %v236_v59, %v233_v54  ;;  %v239_v6 = vmul.u32 %v235_v58, %v234_v55  ;;  %v240_v10 = vmul.u32 %v236_v59, %v234_v55 }
  0x2a   : > { %v263_v15 = vshll.u32 %v260_v8, 16  ;;  %v265_v16 = vshll.u32 %v261_v9, 16  ;;  %v264_v27 = vshrl.u32 %v260_v8, 16  ;;  %v266_v33 = vshrl.u32 %v261_v9, 16 }
  0x2b   : > { %v241_v12 = vshll.u32 %v238_v3, 16  ;;  %v243_v13 = vshll.u32 %v239_v6, 16  ;;  %v242_v23 = vshrl.u32 %v238_v3, 16  ;;  %v244_v30 = vshrl.u32 %v239_v6, 16 }
  0x2c   : > { %vm267_vm6 = vc.u32 %v259_v7, %v263_v15  ;;  %v269_v22 = vadd.s32 %v263_v15, %v259_v7 }
  0x2d   : > { %431 = vperm.xlu1 %607, %v182_v62   ;;  %vm245_vm5 = vc.u32 %v237_v2, %v241_v12  ;;  %v247_v18 = vadd.s32 %v241_v12, %v237_v2  ;;  %v268_v25 = vsel %vm267_vm6, 1, %v647_v0 }
  0x2e   : > { %426 = vperm.xlu0 %606, %v181_v63   ;;  %v246_v20 = vsel %vm245_vm5, 1, %v647_v0  ;;  %v270_v28 = vadd.s32 %v268_v25, %v262_v14  ;;  %vm271_vm8 = vc.u32 %v269_v22, %v265_v16  ;;  %v273_v36 = vadd.s32 %v269_v22, %v265_v16 }
  0x2f   : > { %v248_v24 = vadd.s32 %v246_v20, %v240_v10  ;;  %vm249_vm7 = vc.u32 %v247_v18, %v243_v13  ;;  %v272_v32 = vsel %vm271_vm8, 1, %v647_v0  ;;  %v342_v20 = vsub.f32 0.0, %v700_v4 }
  0x30   : > { %v250_v26 = vsel %vm249_vm7, 1, %v647_v0  ;;  %v274_v34 = vadd.s32 %v272_v32, %v270_v28 }
  0x31   : > { %v252_v31 = vadd.s32 %v250_v26, %v248_v24  ;;  %v343_v26 = vmul.f32 1.442695, %v342_v20 }
  0x32   : > { %v275_v38 = vadd.s32 %v274_v34, %v264_v27 }
  0x33   : > { %v253_v35 = vadd.s32 %v252_v31, %v242_v23  ;;  %609 = vpow2.f32 %v343_v26 }
  0x34   : > { %v276_v41 = vadd.s32 %v275_v38, %v266_v33 }
  0x35   : > { %v254_v40 = vadd.s32 %v253_v35, %v244_v30 }
  0x36   : > { %v280_v44 = vadd.s32 1, %v276_v41 }
  0x37   : > { %vm279_vm9 = vc.u32 %v254_v40, %v273_v36  ;;  %v278_v21 = vadd.s32 %v273_v36, %v254_v40 }
  0x38   : > { %v281_v45 = vsel %vm279_vm9, %v280_v44, %v276_v41 }
  0x39   : > { %v282_v43 = vadd.s32 %v281_v45, %v277_v42  ;;  %v610_v34 = vpop.eup %609 }
  0x3a   : > { %v801_v37 = vperm.slane %v610_v34, 0  ;;  %v803_v38 = vperm.slane %v610_v34, 1 }
  0x3b   : > { %v283_v46 = vadd.s32 536870912, %v282_v43 }
  0x3d   : > { %v284_v47 = vshrl.u32 %v283_v46, 30 }
  0x3f   : > { %v285_v48 = vshll.u32 %v284_v47, 30  ;;  %v308_v13 = vsub.s32 4, %v284_v47 }
  0x41   : > { %v286_v0 = vsub.s32 %v282_v43, %v285_v48  ;;  %v309_v18 = vsel %vm186_vm12, %v308_v13, %v284_v47 }
  0x42   : > { %v311_v23 = vsel %vm784_vm13, 0, %v309_v18 }
  0x43   : > { %vm287_vm10 = vcmp.lt.s32.totalorder %v286_v0, 0  ;;  %v288_v49 = vsub.s32 0, %v286_v0  ;;  %v328_v28 = vand.u32 3, %v311_v23 }
  0x45   : > { %v289_v50 = vsel %vm287_vm10, %v288_v49, %v286_v0  ;;  %vm330_vm14 = vcmp.eq.s32.totalorder %v328_v28, 0  ;;  %vm333_vm15 = vcmp.eq.s32.totalorder %v328_v28, 2  ;;  %vm329_vm0 = vcmp.lt.s32.totalorder %v328_v28, 2 }
  0x46   : > { %v290_v51 = vclz %v289_v50 }
  0x48   : > { %v586_v52 = vadd.s32 4294967294, %v290_v51 }
  0x4a   : > { %vm587_vm11 = vcmp.lt.s32.totalorder %v586_v52, 0 }
  0x4b   : > { %v293_v53 = vsel %vm587_vm11, 0, %v586_v52 }
  0x4c   : > { %v294_v54 = vsub.s32 32, %v293_v53  ;;  %v295_v55 = vshll.u32 %v286_v0, %v293_v53  ;;  %v298_v56 = vsub.s32 4294967266, %v293_v53 }
  0x4e   : > { %v296_v39 = vshrl.u32 %v278_v21, %v294_v54  ;;  %v299_v57 = vadd.s32 127, %v298_v56 }
  0x50   : > { %v297_v58 = vor.u32 %v296_v39, %v295_v55  ;;  %v300_v59 = vshll.u32 %v299_v57, 23 }
  0x52   : > { %v301_v60 = vor.u32 4788187, %v300_v59  ;;  %v304_v61 = vcvt.s32.f32 %v297_v58 }
  0x54   : > { %v302_v62 = vand.u32 2147483647, %v301_v60 }
  0x56   : > { %v305_v63 = vmul.f32 %v304_v61, %v302_v62 }
  0x58   : > { %v306_v2 = vxor.u32 2147483648, %v305_v63 }
  0x5a   : > { %v307_v3 = vsel %vm186_vm12, %v306_v2, %v305_v63 }
  0x5b   : > { %v310_v6 = vsel %vm784_vm13, %v703_v5, %v307_v3 }
  0x5c   : > { %v312_v7 = vmul.f32 %v310_v6, %v310_v6 }
  0x5e   : > { %v320_v8 = vmul.f32 -0.00019511016, %v312_v7  ;;  %v313_v9 = vmul.f32 -0.001358992, %v312_v7 }
  0x60   : > { %v321_v10 = vadd.f32 0.008332121, %v320_v8  ;;  %v314_v12 = vadd.f32 0.041655596, %v313_v9 }
  0x62   : > { %v322_v14 = vmul.f32 %v321_v10, %v312_v7  ;;  %v315_v15 = vmul.f32 %v314_v12, %v312_v7 }
  0x64   : > { %v323_v11 = vadd.f32 -0.16666654, %v322_v14  ;;  %v316_v17 = vadd.f32 -0.4999988, %v315_v15 }
  0x66   : > { %v324_v19 = vmul.f32 %v323_v11, %v312_v7  ;;  %v317_v22 = vmul.f32 %v316_v17, %v312_v7 }
  0x68   : > { %v373_v16 = vpop.permute.xlu2 %372  ;;  %v325_v24 = vadd.f32 1.0, %v324_v19  ;;  %v318_v27 = vadd.f32 1.0, %v317_v22 }
  0x69   : > { %v393_v41 = vsub.f32 %v801_v37, %v373_v16  ;;  %v394_v42 = vsub.f32 %v803_v38, %v373_v16 }
  0x6a   : > { %v326_v25 = vmul.f32 %v325_v24, %v310_v6  ;;  %v334_v31 = vxor.u32 2147483648, %v318_v27 }
  0x6c   : > { %v331_v30 = vxor.u32 2147483648, %v326_v25  ;;  %v335_v33 = vsel %vm333_vm15, %v334_v31, %v326_v25 }
  0x6e   : > { %v332_v32 = vsel %vm330_vm14, %v318_v27, %v331_v30 }
  0x6f   : > { %v336_v36 = vsel %vm329_vm0, %v332_v32, %v335_v33 }
  0x70   : > { %v798_v29 = vpop.permute.xlu2 %377  ;;  %v337_v40 = vsel %vm327_vm1, nan, %v336_v36 }
  0x71   : > { %v338_v43 = vadd.f32 1.0, %v337_v40 }
  0x73   : > { %v339_v0 = vmul.f32 0.5, %v338_v43 }
  0x75   : > { %v341_v52 = vsel %vm340_vm2, %v339_v0, 0.0  ;;  %v396_v0 = vsub.f32 %v803_v38, %v798_v29 }
  0x76   : > { %v811_v56 = vperm.slane %v341_v52, 0  ;;  %v813_v57 = vperm.slane %v341_v52, 1 }
  0x78   : > { %v407_v35 = vpop.permute.xlu2 %406 }
  0x7f   : > { %v363_v44 = vpop.permute.xlu1 %362 }
  0x80   : > { %v353_v45 = vpop.permute.xlu0 %352  ;;  %v422_v46 = vpop.permute.xlu2 %421  ;;  %v389_v16 = vsub.f32 %v801_v37, %v363_v44  ;;  %v390_v20 = vsub.f32 %v803_v38, %v363_v44  ;;  %v395_v44 = vsub.f32 %v801_v37, %v798_v29 }
  0x81   : > { %v442_v47 = vmul.f32 %v422_v46, %v393_v41  ;;  %v443_v48 = vmul.f32 %v422_v46, %v394_v42  ;;  %v385_v62 = vsub.f32 %v801_v37, %v353_v45  ;;  %v386_v63 = vsub.f32 %v803_v38, %v353_v45 }
  0x83   : > { %v456_v49 = vmul.f32 %v442_v47, %v393_v41  ;;  %v457_v5 = vmul.f32 %v443_v48, %v394_v42 }
  0x85   : > { %v478_v50 = vmul.f32 1.442695, %v456_v49  ;;  %v480_v51 = vmul.f32 1.442695, %v457_v5 }
  0x87   : > { %611 = vpow2.f32 %v478_v50  ;;  %v368_v21 = vpop.permute.xlu1 %367 }
  0x88   : > { %v358_v53 = vpop.permute.xlu0 %357  ;;  %613 = vpow2.f32 %v480_v51  ;;  %v391_v17 = vsub.f32 %v801_v37, %v368_v21  ;;  %v392_v18 = vsub.f32 %v803_v38, %v368_v21 }
  0x89   : > { %v387_v54 = vsub.f32 %v801_v37, %v358_v53  ;;  %v388_v55 = vsub.f32 %v803_v38, %v358_v53 }
  0x8b   : > { %v436_v39 = vmul.f32 %v407_v35, %v387_v54  ;;  %v437_v58 = vmul.f32 %v407_v35, %v388_v55 }
  0x8d   : > { %v450_v59 = vmul.f32 %v436_v39, %v387_v54  ;;  %v612_v4 = vpop.eup %611  ;;  %v451_v60 = vmul.f32 %v437_v58, %v388_v55 }
  0x8e   : > { %v614_v61 = vpop.eup %613  ;;  %v503_v1 = vmul.f32 %v612_v4, %v811_v56 }
  0x8f   : > { %v466_v2 = vmul.f32 1.442695, %v450_v59  ;;  %v504_v3 = vmul.f32 %v614_v61, %v813_v57  ;;  %v468_v6 = vmul.f32 1.442695, %v451_v60  ;;  %v402_v7 = vpop.permute.xlu1 %401 }
  0x90   : > { %v383_v8 = vpop.permute.xlu0 %382  ;;  %517 = vst [vmem:[%s818_s24 + $0x40] sm:$0xff] %v503_v1  ;;  %v434_v9 = vmul.f32 %v402_v7, %v385_v62  ;;  %v435_v10 = vmul.f32 %v402_v7, %v386_v63 }
  0x91   : > { %615 = vpow2.f32 %v466_v2  ;;  %518 = vst [vmem:[%s818_s24 + $0x48] sm:$0xff] %v504_v3  ;;  %v397_v47 = vsub.f32 %v801_v37, %v383_v8  ;;  %v398_v48 = vsub.f32 %v803_v38, %v383_v8 }
  0x92   : > { %617 = vpow2.f32 %v468_v6  ;;  %v448_v12 = vmul.f32 %v434_v9, %v385_v62  ;;  %v449_v13 = vmul.f32 %v435_v10, %v386_v63 }
  0x94   : > { %v462_v14 = vmul.f32 1.442695, %v448_v12  ;;  %v464_v15 = vmul.f32 1.442695, %v449_v13 }
  0x96   : > { %619 = vpow2.f32 %v462_v14 }
  0x97   : > { %v616_v11 = vpop.eup %615  ;;  %621 = vpow2.f32 %v464_v15  ;;  %v417_v23 = vpop.permute.xlu1 %416 }
  0x98   : > { %v618_v19 = vpop.eup %617  ;;  %v497_v22 = vmul.f32 %v616_v11, %v811_v56  ;;  %v412_v24 = vpop.permute.xlu0 %411  ;;  %v440_v26 = vmul.f32 %v417_v23, %v391_v17  ;;  %v441_v27 = vmul.f32 %v417_v23, %v392_v18 }
  0x99   : > { %v498_v25 = vmul.f32 %v618_v19, %v813_v57  ;;  %v438_v28 = vmul.f32 %v412_v24, %v389_v16  ;;  %v439_v30 = vmul.f32 %v412_v24, %v390_v20 }
  0x9a   : > { %511 = vst [vmem:[%s818_s24 + $0x10] sm:$0xff] %v497_v22  ;;  %v454_v31 = vmul.f32 %v440_v26, %v391_v17  ;;  %v455_v32 = vmul.f32 %v441_v27, %v392_v18 }
  0x9b   : > { %512 = vst [vmem:[%s818_s24 + $0x18] sm:$0xff] %v498_v25  ;;  %v452_v33 = vmul.f32 %v438_v28, %v389_v16  ;;  %v453_v34 = vmul.f32 %v439_v30, %v390_v20 }
  0x9c   : > { %v620_v35 = vpop.eup %619  ;;  %v474_v36 = vmul.f32 1.442695, %v454_v31  ;;  %v476_v40 = vmul.f32 1.442695, %v455_v32 }
  0x9d   : > { %v470_v41 = vmul.f32 1.442695, %v452_v33  ;;  %v622_v42 = vpop.eup %621  ;;  %v495_v45 = vmul.f32 %v620_v35, %v811_v56  ;;  %v472_v43 = vmul.f32 1.442695, %v453_v34 }
  0x9e   : > { %v496_v46 = vmul.f32 %v622_v42, %v813_v57  ;;  %623 = vpow2.f32 %v474_v36 }
  0x9f   : > { %509 = vst [vmem:[%s818_s24] sm:$0xff] %v495_v45  ;;  %625 = vpow2.f32 %v476_v40  ;;  %v432_v49 = vpop.permute.xlu1 %431 }
  0xa0   : > { %v427_v5 = vpop.permute.xlu0 %426  ;;  %510 = vst [vmem:[%s818_s24 + $0x8] sm:$0xff] %v496_v46  ;;  %627 = vpow2.f32 %v470_v41  ;;  %v446_v50 = vmul.f32 %v432_v49, %v397_v47  ;;  %v447_v51 = vmul.f32 %v432_v49, %v398_v48 }
  0xa1   : > { %v444_v52 = vmul.f32 %v427_v5, %v395_v44  ;;  %629 = vpow2.f32 %v472_v43  ;;  %v445_v21 = vmul.f32 %v427_v5, %v396_v0 }
  0xa2   : > { %v460_v53 = vmul.f32 %v446_v50, %v397_v47  ;;  %v461_v37 = vmul.f32 %v447_v51, %v398_v48 }
  0xa3   : > { %v458_v54 = vmul.f32 %v444_v52, %v395_v44  ;;  %v459_v55 = vmul.f32 %v445_v21, %v396_v0 }
  0xa4   : > { %v624_v39 = vpop.eup %623  ;;  %v486_v58 = vmul.f32 1.442695, %v460_v53  ;;  %v488_v29 = vmul.f32 1.442695, %v461_v37 }
  0xa5   : > { %v482_v38 = vmul.f32 1.442695, %v458_v54  ;;  %v626_v59 = vpop.eup %625  ;;  %v501_v4 = vmul.f32 %v624_v39, %v811_v56  ;;  %v484_v60 = vmul.f32 1.442695, %v459_v55 }
  0xa6   : > { %v628_v61 = vpop.eup %627  ;;  %v502_v62 = vmul.f32 %v626_v59, %v813_v57  ;;  %631 = vpow2.f32 %v486_v58 }
  0xa7   : > { %v630_v63 = vpop.eup %629  ;;  %515 = vst [vmem:[%s818_s24 + $0x30] sm:$0xff] %v501_v4  ;;  %v499_v1 = vmul.f32 %v628_v61, %v811_v56  ;;  %633 = vpow2.f32 %v488_v29 }
  0xa8   : > { %516 = vst [vmem:[%s818_s24 + $0x38] sm:$0xff] %v502_v62  ;;  %v500_v2 = vmul.f32 %v630_v63, %v813_v57  ;;  %635 = vpow2.f32 %v482_v38 }
  0xa9   : > { %513 = vst [vmem:[%s818_s24 + $0x20] sm:$0xff] %v499_v1  ;;  %637 = vpow2.f32 %v484_v60 }
  0xaa   : > { %514 = vst [vmem:[%s818_s24 + $0x28] sm:$0xff] %v500_v2 }
  0xac   : > { %v632_v3 = vpop.eup %631 }
  0xad   : > { %v634_v6 = vpop.eup %633  ;;  %v507_v7 = vmul.f32 %v632_v3, %v811_v56 }
  0xae   : > { %v636_v8 = vpop.eup %635  ;;  %v508_v9 = vmul.f32 %v634_v6, %v813_v57 }
  0xaf   : > { %v638_v10 = vpop.eup %637  ;;  %521 = vst [vmem:[%s818_s24 + $0x60] sm:$0x3] %v507_v7  ;;  %v505_v12 = vmul.f32 %v636_v8, %v811_v56 }
  0xb0   : > { %522 = vst [vmem:[%s818_s24 + $0x68] sm:$0x3] %v508_v9  ;;  %v506_v13 = vmul.f32 %v638_v10, %v813_v57 }
  0xb1   : > { %519 = vst [vmem:[%s818_s24 + $0x50] sm:$0xff] %v505_v12 }
  0xb2   : > { %520 = vst [vmem:[%s818_s24 + $0x58] sm:$0xff] %v506_v13 }
  0xb3 PF: > { %s13_s12 = sadd.s32 1, %s645_s12  }
  0xb4   : > { %p10_p4 = scmp.ge.s32.totalorder %s13_s12, 4  }
  0xb6   :  { %12 = sbr.rel (!%p10_p4) target bundleno = 1 (0x1), region = 62 }

</bundles_post_ra>
